<compile_context>
chip_gen: v5e
topology: v5e:2x2
jax: 0.10.0
libtpu: 0.0.40
codegen_flags: <defaults>
</compile_context>

<pallas_src>
import jax
import jax.numpy as jnp
from jax.experimental import pallas as pl
from jax.experimental.pallas import tpu as pltpu  # noqa: F401  (TPU backend assumed)

# ---- small, forward-consistent sizes -----------------------------------
B = 2             # batch
S = 8             # sequence length
H = 32            # hidden_size (stands in for 768)
NUM_HEADS = 2
HEAD_DIM = H // NUM_HEADS
FFN = 64
NUM_CLASSES = 2
C_PAD = 128       # lane-dense padding for the classifier output
VOCAB = 100
NUM_SEGMENTS = 2
DR_RATE = None    # matches default -> dropout is identity


# ---- small pure-jnp helpers (used both in-kernel and in the reference) --
def _layer_norm(x, g, b, eps=1e-12):
    mu = jnp.mean(x, axis=-1, keepdims=True)
    var = jnp.mean((x - mu) * (x - mu), axis=-1, keepdims=True)
    return (x - mu) * jax.lax.rsqrt(var + eps) * g + b


def _gelu(x):
    # tanh approximation of GELU (BERT-style); tanh goes to the EUP.
    c = jnp.float32(0.7978845608028654)  # sqrt(2/pi)
    return 0.5 * x * (1.0 + jnp.tanh(c * (x + 0.044715 * x * x * x)))


# =========================================================================
# The single fused kernel: mask-gen + encoder layer + pooler + classifier
# =========================================================================
def _fused_bert_classifier_kernel(
        vl_ref,      # (B, 1, 1) int32  valid lengths
        x_ref,       # (B*S, H)  f32    embedded input, batch flattened
        wqkv_ref,    # (H, 3H)          packed Q|K|V projection weight
        wo_ref,      # (H, H)           attention output projection
        w1_ref,      # (H, FFN)
        w2_ref,      # (FFN, H)
        wp_ref,      # (H, H)           pooler weight
        wc_ref,      # (H, C_PAD)       classifier weight, zero-padded to 128 lanes
        bqkv_ref,    # (1, 3H)
        b1_ref,      # (1, FFN)
        bc_ref,      # (1, C_PAD)
        hvec_ref,    # (8, H) rows: bo, ln1g, ln1b, b2, ln2g, ln2b, bp, <unused>
        out_ref):    # (B, C_PAD)
    f32 = jnp.float32

    # ---- 1) gen_attention_mask: additive key mask from valid_length --------
    col = jax.lax.broadcasted_iota(jnp.int32, (B, 1, S), 2)
    key_mask = (col < vl_ref[...]).astype(f32)                    # (B, 1, S)
    # hoisted: one broadcast, reused by every head
    neg = jnp.broadcast_to((key_mask - 1.0) * f32(1e9), (B, S, S))

    # ---- unpack the small-vector slab ---------------------------------------
    hv = hvec_ref[...]                                            # (8, H)
    bo, ln1g, ln1b = hv[0:1, :], hv[1:2, :], hv[2:3, :]
    b2, ln2g, ln2b = hv[3:4, :], hv[4:5, :], hv[5:6, :]
    bp = hv[6:7, :]

    # ---- 2) packed QKV projection (one MXU pass, K=H, N=3H) -----------------
    x2 = x_ref[...]                                               # (B*S, H)
    qkv = jnp.dot(x2, wqkv_ref[...], preferred_element_type=f32) + bqkv_ref[...]
    qkv3 = qkv.reshape(B, S, 3 * H)                               # heads on lanes

    # ---- 3) masked multi-head self-attention, batched over B ----------------
    scale = f32(1.0 / (HEAD_DIM ** 0.5))
    wo = wo_ref[...]
    attn = None
    for h in range(NUM_HEADS):                                    # static 2-way loop
        q_h = qkv3[:, :, h * HEAD_DIM:(h + 1) * HEAD_DIM] * scale                # (B,S,D)
        k_h = qkv3[:, :, H + h * HEAD_DIM:H + (h + 1) * HEAD_DIM]                # (B,S,D)
        v_h = qkv3[:, :, 2 * H + h * HEAD_DIM:2 * H + (h + 1) * HEAD_DIM]        # (B,S,D)

        s = jnp.einsum('bqd,bkd->bqk', q_h, k_h,
                       preferred_element_type=f32) + neg                         # (B,S,S)
        s = s - jnp.max(s, axis=-1, keepdims=True)
        p = jnp.exp(s)
        p = p * pl.reciprocal(jnp.sum(p, axis=-1, keepdims=True), approx=True)
        ctx = jnp.einsum('bqk,bkd->bqd', p, v_h, preferred_element_type=f32)     # (B,S,D)

        # fold the head directly into the output projection (no concat):
        part = jnp.dot(ctx.reshape(B * S, HEAD_DIM),
                       wo[h * HEAD_DIM:(h + 1) * HEAD_DIM, :],
                       preferred_element_type=f32)                               # (B*S,H)
        attn = part if attn is None else attn + part
    attn = attn + bo

    # ---- 4) residual + LN1, FFN, residual + LN2 -----------------------------
    h1 = _layer_norm(x2 + attn, ln1g, ln1b)                       # (B*S, H)
    f = _gelu(jnp.dot(h1, w1_ref[...], preferred_element_type=f32) + b1_ref[...])
    f = jnp.dot(f, w2_ref[...], preferred_element_type=f32) + b2
    h2 = _layer_norm(h1 + f, ln2g, ln2b)                          # (B*S, H)

    # ---- 5) pooler on CLS rows + classifier ---------------------------------
    cls = h2.reshape(B, S, H)[:, 0, :]                            # (B, H)
    pooled = jnp.tanh(jnp.dot(cls, wp_ref[...], preferred_element_type=f32) + bp)
    # dr_rate is None -> dropout is the identity (eval semantics).
    out_ref[...] = (jnp.dot(pooled, wc_ref[...], preferred_element_type=f32)
                    + bc_ref[...])                                # (B, C_PAD) lane-dense


def _full_spec(arr):
    nd = arr.ndim
    return pl.BlockSpec(arr.shape, lambda nd=nd: (0,) * nd)


def bert_classifier_pallas(packed, x_emb, valid_length):
    """Run the fused kernel; returns (B, NUM_CLASSES) logits."""
    vl = valid_length.reshape(B, 1, 1).astype(jnp.int32)
    x2 = x_emb.reshape(B * S, H).astype(jnp.float32)
    args = (vl, x2,
            packed["wqkv"], packed["wo"], packed["w1"], packed["w2"],
            packed["wp"], packed["wc_pad"],
            packed["bqkv"], packed["b1"], packed["bc_pad"], packed["hvec"])
    out = pl.pallas_call(
        _fused_bert_classifier_kernel,
        out_shape=jax.ShapeDtypeStruct((B, C_PAD), jnp.float32),
        in_specs=[_full_spec(a) for a in args],
        out_specs=pl.BlockSpec((B, C_PAD), lambda: (0, 0)),
    )(*args)
    return out[:, :NUM_CLASSES]


# =========================================================================
# Parameter init (deterministic, synthetic) + packing for the fused kernel
# =========================================================================
def init_params(key):
    ks = jax.random.split(key, 12)

    def w(k, shape):
        return (0.02 * jax.random.normal(k, shape)).astype(jnp.float32)

    zeros = lambda shape: jnp.zeros(shape, jnp.float32)
    ones = lambda shape: jnp.ones(shape, jnp.float32)
    return {
        # embeddings
        "tok_emb": w(ks[0], (VOCAB, H)),
        "pos_emb": w(ks[1], (S, H)),
        "seg_emb": w(ks[2], (NUM_SEGMENTS, H)),
        # encoder layer
        "wq": w(ks[3], (H, H)), "bq": zeros((1, H)),
        "wk": w(ks[4], (H, H)), "bk": zeros((1, H)),
        "wv": w(ks[5], (H, H)), "bv": zeros((1, H)),
        "wo": w(ks[6], (H, H)), "bo": zeros((1, H)),
        "ln1g": ones((1, H)), "ln1b": zeros((1, H)),
        "w1": w(ks[7], (H, FFN)), "b1": zeros((1, FFN)),
        "w2": w(ks[8], (FFN, H)), "b2": zeros((1, H)),
        "ln2g": ones((1, H)), "ln2b": zeros((1, H)),
        # pooler
        "wp": w(ks[9], (H, H)), "bp": zeros((1, H)),
        # classifier (nn.Linear(hidden_size, num_classes))
        "wc": w(ks[10], (H, NUM_CLASSES)), "bc": zeros((1, NUM_CLASSES)),
    }


def pack_params(p):
    """Pack the logical parameters into the kernel-friendly fused layout."""
    wqkv = jnp.concatenate([p["wq"], p["wk"], p["wv"]], axis=1)          # (H, 3H)
    bqkv = jnp.concatenate([p["bq"], p["bk"], p["bv"]], axis=1)          # (1, 3H)
    # seven H-wide vectors -> one (8, H) slab (last row unused)
    hvec = jnp.concatenate(
        [p["bo"], p["ln1g"], p["ln1b"], p["b2"], p["ln2g"], p["ln2b"],
         p["bp"], jnp.zeros((1, H), jnp.float32)], axis=0)               # (8, H)
    # classifier weight/bias zero-padded to a lane-dense 128-wide slab
    wc_pad = jnp.zeros((H, C_PAD), jnp.float32).at[:, :NUM_CLASSES].set(p["wc"])
    bc_pad = jnp.zeros((1, C_PAD), jnp.float32).at[:, :NUM_CLASSES].set(p["bc"])
    return {
        "tok_emb": p["tok_emb"], "pos_emb": p["pos_emb"], "seg_emb": p["seg_emb"],
        "wqkv": wqkv, "bqkv": bqkv, "wo": p["wo"],
        "w1": p["w1"], "b1": p["b1"], "w2": p["w2"],
        "wp": p["wp"], "wc_pad": wc_pad, "bc_pad": bc_pad, "hvec": hvec,
    }


@jax.jit
def bert_classifier_forward(packed, token_ids, valid_length, segment_ids):
    # Embedding gathers are JAX glue; everything else is one fused Pallas kernel.
    x = (packed["tok_emb"][token_ids]
         + packed["pos_emb"][None, :, :]
         + packed["seg_emb"][segment_ids]).astype(jnp.float32)
    return bert_classifier_pallas(packed, x, valid_length)


# =========================================================================
# Pure-JAX reference (same math, unfused) for a correctness check
# =========================================================================
def _reference_forward(p, token_ids, valid_length, segment_ids):
    hp = jax.lax.Precision.HIGHEST

    def dot(a, b):
        return jnp.dot(a, b, precision=hp, preferred_element_type=jnp.float32)

    x = (p["tok_emb"][token_ids] + p["pos_emb"][None, :, :]
         + p["seg_emb"][segment_ids]).astype(jnp.float32)
    x2 = x.reshape(B * S, H)
    mask = (jnp.arange(S)[None, :] < valid_length[:, None]).astype(jnp.float32)  # (B,S)
    neg = (mask - 1.0)[:, None, :] * jnp.float32(1e9)                            # (B,1,S)

    q = dot(x2, p["wq"]) + p["bq"]
    k = dot(x2, p["wk"]) + p["bk"]
    v = dot(x2, p["wv"]) + p["bv"]
    ctxs = []
    for h in range(NUM_HEADS):
        sl = slice(h * HEAD_DIM, (h + 1) * HEAD_DIM)
        qh = q[:, sl].reshape(B, S, HEAD_DIM)
        kh = k[:, sl].reshape(B, S, HEAD_DIM)
        vh = v[:, sl].reshape(B, S, HEAD_DIM)
        s = jnp.einsum('bqd,bkd->bqk', qh, kh, precision=hp) / (HEAD_DIM ** 0.5) + neg
        pw = jax.nn.softmax(s, axis=-1)
        ctxs.append(jnp.einsum('bqk,bkd->bqd', pw, vh, precision=hp)
                    .reshape(B * S, HEAD_DIM))
    ctx = jnp.concatenate(ctxs, axis=-1)
    attn = dot(ctx, p["wo"]) + p["bo"]
    h1 = _layer_norm(x2 + attn, p["ln1g"], p["ln1b"])
    f = _gelu(dot(h1, p["w1"]) + p["b1"])
    f = dot(f, p["w2"]) + p["b2"]
    h2 = _layer_norm(h1 + f, p["ln2g"], p["ln2b"])
    cls = h2.reshape(B, S, H)[:, 0, :]
    pooled = jnp.tanh(dot(cls, p["wp"]) + p["bp"])
    return dot(pooled, p["wc"]) + p["bc"]


if __name__ == "__main__":
    key = jax.random.PRNGKey(0)
    kp, kt = jax.random.split(key)
    raw_params = init_params(kp)
    packed_params = pack_params(raw_params)

    token_ids = jax.random.randint(kt, (B, S), 0, VOCAB, dtype=jnp.int32)
    segment_ids = jnp.zeros((B, S), dtype=jnp.int32)
    valid_length = jnp.array([5, 8], dtype=jnp.int32)

    logits = bert_classifier_forward(packed_params, token_ids, valid_length, segment_ids)
    jax.block_until_ready(logits)

    assert logits.shape == (B, NUM_CLASSES) and logits.dtype == jnp.float32
    assert bool(jnp.all(jnp.isfinite(logits)))

    ref = _reference_forward(raw_params, token_ids, valid_length, segment_ids)
    assert bool(jnp.allclose(logits, ref, atol=5e-3, rtol=0.0)), (
        f"kernel/reference mismatch: {logits} vs {ref}")
    print("KERNEL_OK")
</pallas_src>

<mosaic_0001>
module attributes {stable_mosaic.version = 11 : i64} {
  func.func @_fused_bert_classifier_kernel(%arg0: memref<2x1x1xi32, #tpu.memory_space<vmem>>, %arg1: memref<16x32xf32, #tpu.memory_space<vmem>>, %arg2: memref<32x96xf32, #tpu.memory_space<vmem>>, %arg3: memref<32x32xf32, #tpu.memory_space<vmem>>, %arg4: memref<32x64xf32, #tpu.memory_space<vmem>>, %arg5: memref<64x32xf32, #tpu.memory_space<vmem>>, %arg6: memref<32x32xf32, #tpu.memory_space<vmem>>, %arg7: memref<32x128xf32, #tpu.memory_space<vmem>>, %arg8: memref<1x96xf32, #tpu.memory_space<vmem>>, %arg9: memref<1x64xf32, #tpu.memory_space<vmem>>, %arg10: memref<1x128xf32, #tpu.memory_space<vmem>>, %arg11: memref<8x32xf32, #tpu.memory_space<vmem>>, %arg12: memref<2x128xf32, #tpu.memory_space<vmem>>) attributes {dimension_semantics = [], scalar_prefetch = 0 : i64, scratch_operands = 0 : i64, tpu.core_type = #tpu.core_type<tc>} {
    %0 = tpu.iota {dimensions = array<i32: 2>} : vector<2x1x8xi32>
    %c0 = arith.constant 0 : index
    %c0_0 = arith.constant 0 : index
    %c0_1 = arith.constant 0 : index
    %1 = vector.load %arg0[%c0, %c0_0, %c0_1] : memref<2x1x1xi32, #tpu.memory_space<vmem>>, vector<2x1x1xi32>
    %2 = vector.broadcast %1 : vector<2x1x1xi32> to vector<2x1x8xi32>
    %3 = arith.cmpi slt, %0, %2 : vector<2x1x8xi32>
    %4 = arith.extui %3 : vector<2x1x8xi1> to vector<2x1x8xi32>
    %5 = arith.sitofp %4 : vector<2x1x8xi32> to vector<2x1x8xf32>
    %cst = arith.constant 1.000000e+00 : f32
    %6 = vector.broadcast %cst : f32 to vector<2x1x8xf32>
    %7 = arith.subf %5, %6 : vector<2x1x8xf32>
    %cst_2 = arith.constant 1.000000e+09 : f32
    %8 = vector.broadcast %cst_2 : f32 to vector<2x1x8xf32>
    %9 = arith.mulf %7, %8 : vector<2x1x8xf32>
    %10 = vector.shape_cast %9 : vector<2x1x8xf32> to vector<2x1x8xf32>
    %11 = vector.broadcast %10 : vector<2x1x8xf32> to vector<2x8x8xf32>
    %c0_3 = arith.constant 0 : index
    %c0_4 = arith.constant 0 : index
    %12 = vector.load %arg11[%c0_3, %c0_4] : memref<8x32xf32, #tpu.memory_space<vmem>>, vector<8x32xf32>
    %13 = vector.extract_strided_slice %12 {offsets = [0, 0], sizes = [1, 32], strides = [1, 1]} : vector<8x32xf32> to vector<1x32xf32>
    %14 = vector.extract_strided_slice %12 {offsets = [1, 0], sizes = [1, 32], strides = [1, 1]} : vector<8x32xf32> to vector<1x32xf32>
    %15 = vector.extract_strided_slice %12 {offsets = [2, 0], sizes = [1, 32], strides = [1, 1]} : vector<8x32xf32> to vector<1x32xf32>
    %16 = vector.extract_strided_slice %12 {offsets = [3, 0], sizes = [1, 32], strides = [1, 1]} : vector<8x32xf32> to vector<1x32xf32>
    %17 = vector.extract_strided_slice %12 {offsets = [4, 0], sizes = [1, 32], strides = [1, 1]} : vector<8x32xf32> to vector<1x32xf32>
    %18 = vector.extract_strided_slice %12 {offsets = [5, 0], sizes = [1, 32], strides = [1, 1]} : vector<8x32xf32> to vector<1x32xf32>
    %19 = vector.extract_strided_slice %12 {offsets = [6, 0], sizes = [1, 32], strides = [1, 1]} : vector<8x32xf32> to vector<1x32xf32>
    %c0_5 = arith.constant 0 : index
    %c0_6 = arith.constant 0 : index
    %20 = vector.load %arg1[%c0_5, %c0_6] : memref<16x32xf32, #tpu.memory_space<vmem>>, vector<16x32xf32>
    %c0_7 = arith.constant 0 : index
    %c0_8 = arith.constant 0 : index
    %21 = vector.load %arg2[%c0_7, %c0_8] : memref<32x96xf32, #tpu.memory_space<vmem>>, vector<32x96xf32>
    %cst_9 = arith.constant dense<0.000000e+00> : vector<16x96xf32>
    %22 = tpu.matmul %20, %21, %cst_9 {dimension_numbers = #tpu.dot_dimension_numbers<[1], [0], [0], [1], [0, 0, 1, 1], [], []>} : vector<16x32xf32>, vector<32x96xf32>, vector<16x96xf32> -> vector<16x96xf32>
    %c0_10 = arith.constant 0 : index
    %c0_11 = arith.constant 0 : index
    %23 = vector.load %arg8[%c0_10, %c0_11] : memref<1x96xf32, #tpu.memory_space<vmem>>, vector<1x96xf32>
    %24 = vector.broadcast %23 : vector<1x96xf32> to vector<16x96xf32>
    %25 = arith.addf %22, %24 : vector<16x96xf32>
    %26 = vector.shape_cast %25 : vector<16x96xf32> to vector<2x8x96xf32>
    %c0_12 = arith.constant 0 : index
    %c0_13 = arith.constant 0 : index
    %27 = vector.load %arg3[%c0_12, %c0_13] : memref<32x32xf32, #tpu.memory_space<vmem>>, vector<32x32xf32>
    %28 = vector.extract_strided_slice %26 {offsets = [0, 0, 0], sizes = [2, 8, 16], strides = [1, 1, 1]} : vector<2x8x96xf32> to vector<2x8x16xf32>
    %cst_14 = arith.constant 2.500000e-01 : f32
    %29 = vector.broadcast %cst_14 : f32 to vector<2x8x16xf32>
    %30 = arith.mulf %28, %29 : vector<2x8x16xf32>
    %31 = vector.extract_strided_slice %26 {offsets = [0, 0, 32], sizes = [2, 8, 16], strides = [1, 1, 1]} : vector<2x8x96xf32> to vector<2x8x16xf32>
    %32 = vector.extract_strided_slice %26 {offsets = [0, 0, 64], sizes = [2, 8, 16], strides = [1, 1, 1]} : vector<2x8x96xf32> to vector<2x8x16xf32>
    "tpu.trace_start"() <{level = 10 : i32, message = "bqd,bkd->bqk"}> : () -> ()
    %cst_15 = arith.constant dense<0.000000e+00> : vector<2x8x8xf32>
    %33 = tpu.matmul %30, %31, %cst_15 {dimension_numbers = #tpu.dot_dimension_numbers<[2], [2], [1], [1], [0, 0, 0, 1, 1, 1], [0], [0]>} : vector<2x8x16xf32>, vector<2x8x16xf32>, vector<2x8x8xf32> -> vector<2x8x8xf32>
    "tpu.trace_stop"() : () -> ()
    %34 = arith.addf %33, %11 : vector<2x8x8xf32>
    %cst_16 = arith.constant dense<0xFF800000> : vector<2x8xf32>
    %35 = vector.multi_reduction <maximumf>, %34, %cst_16 [2] : vector<2x8x8xf32> to vector<2x8xf32>
    %36 = vector.shape_cast %35 : vector<2x8xf32> to vector<2x8x1xf32>
    %37 = vector.broadcast %36 : vector<2x8x1xf32> to vector<2x8x8xf32>
    %38 = arith.subf %34, %37 : vector<2x8x8xf32>
    %39 = math.exp %38 : vector<2x8x8xf32>
    %cst_17 = arith.constant dense<0.000000e+00> : vector<2x8xf32>
    %40 = vector.multi_reduction <add>, %39, %cst_17 [2] : vector<2x8x8xf32> to vector<2x8xf32>
    %41 = vector.shape_cast %40 : vector<2x8xf32> to vector<2x8x1xf32>
    %42 = tpu.reciprocal %41 {approx = true} : vector<2x8x1xf32> -> vector<2x8x1xf32>
    %43 = vector.broadcast %42 : vector<2x8x1xf32> to vector<2x8x8xf32>
    %44 = arith.mulf %39, %43 : vector<2x8x8xf32>
    "tpu.trace_start"() <{level = 10 : i32, message = "bqk,bkd->bqd"}> : () -> ()
    %cst_18 = arith.constant dense<0.000000e+00> : vector<2x8x16xf32>
    %45 = tpu.matmul %44, %32, %cst_18 {dimension_numbers = #tpu.dot_dimension_numbers<[2], [1], [1], [2], [0, 0, 0, 1, 1, 2], [0], [0]>} : vector<2x8x8xf32>, vector<2x8x16xf32>, vector<2x8x16xf32> -> vector<2x8x16xf32>
    "tpu.trace_stop"() : () -> ()
    %46 = vector.shape_cast %45 : vector<2x8x16xf32> to vector<16x16xf32>
    %47 = vector.extract_strided_slice %27 {offsets = [0, 0], sizes = [16, 32], strides = [1, 1]} : vector<32x32xf32> to vector<16x32xf32>
    %cst_19 = arith.constant dense<0.000000e+00> : vector<16x32xf32>
    %48 = tpu.matmul %46, %47, %cst_19 {dimension_numbers = #tpu.dot_dimension_numbers<[1], [0], [0], [1], [0, 0, 1, 1], [], []>} : vector<16x16xf32>, vector<16x32xf32>, vector<16x32xf32> -> vector<16x32xf32>
    %49 = vector.extract_strided_slice %26 {offsets = [0, 0, 16], sizes = [2, 8, 16], strides = [1, 1, 1]} : vector<2x8x96xf32> to vector<2x8x16xf32>
    %cst_20 = arith.constant 2.500000e-01 : f32
    %50 = vector.broadcast %cst_20 : f32 to vector<2x8x16xf32>
    %51 = arith.mulf %49, %50 : vector<2x8x16xf32>
    %52 = vector.extract_strided_slice %26 {offsets = [0, 0, 48], sizes = [2, 8, 16], strides = [1, 1, 1]} : vector<2x8x96xf32> to vector<2x8x16xf32>
    %53 = vector.extract_strided_slice %26 {offsets = [0, 0, 80], sizes = [2, 8, 16], strides = [1, 1, 1]} : vector<2x8x96xf32> to vector<2x8x16xf32>
    "tpu.trace_start"() <{level = 10 : i32, message = "bqd,bkd->bqk"}> : () -> ()
    %cst_21 = arith.constant dense<0.000000e+00> : vector<2x8x8xf32>
    %54 = tpu.matmul %51, %52, %cst_21 {dimension_numbers = #tpu.dot_dimension_numbers<[2], [2], [1], [1], [0, 0, 0, 1, 1, 1], [0], [0]>} : vector<2x8x16xf32>, vector<2x8x16xf32>, vector<2x8x8xf32> -> vector<2x8x8xf32>
    "tpu.trace_stop"() : () -> ()
    %55 = arith.addf %54, %11 : vector<2x8x8xf32>
    %cst_22 = arith.constant dense<0xFF800000> : vector<2x8xf32>
    %56 = vector.multi_reduction <maximumf>, %55, %cst_22 [2] : vector<2x8x8xf32> to vector<2x8xf32>
    %57 = vector.shape_cast %56 : vector<2x8xf32> to vector<2x8x1xf32>
    %58 = vector.broadcast %57 : vector<2x8x1xf32> to vector<2x8x8xf32>
    %59 = arith.subf %55, %58 : vector<2x8x8xf32>
    %60 = math.exp %59 : vector<2x8x8xf32>
    %cst_23 = arith.constant dense<0.000000e+00> : vector<2x8xf32>
    %61 = vector.multi_reduction <add>, %60, %cst_23 [2] : vector<2x8x8xf32> to vector<2x8xf32>
    %62 = vector.shape_cast %61 : vector<2x8xf32> to vector<2x8x1xf32>
    %63 = tpu.reciprocal %62 {approx = true} : vector<2x8x1xf32> -> vector<2x8x1xf32>
    %64 = vector.broadcast %63 : vector<2x8x1xf32> to vector<2x8x8xf32>
    %65 = arith.mulf %60, %64 : vector<2x8x8xf32>
    "tpu.trace_start"() <{level = 10 : i32, message = "bqk,bkd->bqd"}> : () -> ()
    %cst_24 = arith.constant dense<0.000000e+00> : vector<2x8x16xf32>
    %66 = tpu.matmul %65, %53, %cst_24 {dimension_numbers = #tpu.dot_dimension_numbers<[2], [1], [1], [2], [0, 0, 0, 1, 1, 2], [0], [0]>} : vector<2x8x8xf32>, vector<2x8x16xf32>, vector<2x8x16xf32> -> vector<2x8x16xf32>
    "tpu.trace_stop"() : () -> ()
    %67 = vector.shape_cast %66 : vector<2x8x16xf32> to vector<16x16xf32>
    %68 = vector.extract_strided_slice %27 {offsets = [16, 0], sizes = [16, 32], strides = [1, 1]} : vector<32x32xf32> to vector<16x32xf32>
    %cst_25 = arith.constant dense<0.000000e+00> : vector<16x32xf32>
    %69 = tpu.matmul %67, %68, %cst_25 {dimension_numbers = #tpu.dot_dimension_numbers<[1], [0], [0], [1], [0, 0, 1, 1], [], []>} : vector<16x16xf32>, vector<16x32xf32>, vector<16x32xf32> -> vector<16x32xf32>
    %70 = arith.addf %48, %69 : vector<16x32xf32>
    %71 = vector.broadcast %13 : vector<1x32xf32> to vector<16x32xf32>
    %72 = arith.addf %70, %71 : vector<16x32xf32>
    %73 = arith.addf %20, %72 : vector<16x32xf32>
    %cst_26 = arith.constant dense<0.000000e+00> : vector<16xf32>
    %74 = vector.multi_reduction <add>, %73, %cst_26 [1] : vector<16x32xf32> to vector<16xf32>
    %75 = vector.shape_cast %74 : vector<16xf32> to vector<16x1xf32>
    %cst_27 = arith.constant 3.200000e+01 : f32
    %76 = vector.broadcast %cst_27 : f32 to vector<16x1xf32>
    %77 = arith.divf %75, %76 : vector<16x1xf32>
    %78 = vector.broadcast %77 : vector<16x1xf32> to vector<16x32xf32>
    %79 = arith.subf %73, %78 : vector<16x32xf32>
    %80 = vector.broadcast %77 : vector<16x1xf32> to vector<16x32xf32>
    %81 = arith.subf %73, %80 : vector<16x32xf32>
    %82 = arith.mulf %79, %81 : vector<16x32xf32>
    %cst_28 = arith.constant dense<0.000000e+00> : vector<16xf32>
    %83 = vector.multi_reduction <add>, %82, %cst_28 [1] : vector<16x32xf32> to vector<16xf32>
    %84 = vector.shape_cast %83 : vector<16xf32> to vector<16x1xf32>
    %cst_29 = arith.constant 3.200000e+01 : f32
    %85 = vector.broadcast %cst_29 : f32 to vector<16x1xf32>
    %86 = arith.divf %84, %85 : vector<16x1xf32>
    %87 = vector.broadcast %77 : vector<16x1xf32> to vector<16x32xf32>
    %88 = arith.subf %73, %87 : vector<16x32xf32>
    %cst_30 = arith.constant 9.99999996E-13 : f32
    %89 = vector.broadcast %cst_30 : f32 to vector<16x1xf32>
    %90 = arith.addf %86, %89 : vector<16x1xf32>
    %91 = math.rsqrt %90 : vector<16x1xf32>
    %92 = vector.broadcast %91 : vector<16x1xf32> to vector<16x32xf32>
    %93 = arith.mulf %88, %92 : vector<16x32xf32>
    %94 = vector.broadcast %14 : vector<1x32xf32> to vector<16x32xf32>
    %95 = arith.mulf %93, %94 : vector<16x32xf32>
    %96 = vector.broadcast %15 : vector<1x32xf32> to vector<16x32xf32>
    %97 = arith.addf %95, %96 : vector<16x32xf32>
    %c0_31 = arith.constant 0 : index
    %c0_32 = arith.constant 0 : index
    %98 = vector.load %arg4[%c0_31, %c0_32] : memref<32x64xf32, #tpu.memory_space<vmem>>, vector<32x64xf32>
    %cst_33 = arith.constant dense<0.000000e+00> : vector<16x64xf32>
    %99 = tpu.matmul %97, %98, %cst_33 {dimension_numbers = #tpu.dot_dimension_numbers<[1], [0], [0], [1], [0, 0, 1, 1], [], []>} : vector<16x32xf32>, vector<32x64xf32>, vector<16x64xf32> -> vector<16x64xf32>
    %c0_34 = arith.constant 0 : index
    %c0_35 = arith.constant 0 : index
    %100 = vector.load %arg9[%c0_34, %c0_35] : memref<1x64xf32, #tpu.memory_space<vmem>>, vector<1x64xf32>
    %101 = vector.broadcast %100 : vector<1x64xf32> to vector<16x64xf32>
    %102 = arith.addf %99, %101 : vector<16x64xf32>
    %cst_36 = arith.constant 5.000000e-01 : f32
    %103 = vector.broadcast %cst_36 : f32 to vector<16x64xf32>
    %104 = arith.mulf %103, %102 : vector<16x64xf32>
    %cst_37 = arith.constant 4.471500e-02 : f32
    %105 = vector.broadcast %cst_37 : f32 to vector<16x64xf32>
    %106 = arith.mulf %105, %102 : vector<16x64xf32>
    %107 = arith.mulf %106, %102 : vector<16x64xf32>
    %108 = arith.mulf %107, %102 : vector<16x64xf32>
    %109 = arith.addf %102, %108 : vector<16x64xf32>
    %cst_38 = arith.constant 0.797884583 : f32
    %110 = vector.broadcast %cst_38 : f32 to vector<16x64xf32>
    %111 = arith.mulf %110, %109 : vector<16x64xf32>
    %112 = math.tanh %111 : vector<16x64xf32>
    %cst_39 = arith.constant 1.000000e+00 : f32
    %113 = vector.broadcast %cst_39 : f32 to vector<16x64xf32>
    %114 = arith.addf %113, %112 : vector<16x64xf32>
    %115 = arith.mulf %104, %114 : vector<16x64xf32>
    %c0_40 = arith.constant 0 : index
    %c0_41 = arith.constant 0 : index
    %116 = vector.load %arg5[%c0_40, %c0_41] : memref<64x32xf32, #tpu.memory_space<vmem>>, vector<64x32xf32>
    %cst_42 = arith.constant dense<0.000000e+00> : vector<16x32xf32>
    %117 = tpu.matmul %115, %116, %cst_42 {dimension_numbers = #tpu.dot_dimension_numbers<[1], [0], [0], [1], [0, 0, 1, 1], [], []>} : vector<16x64xf32>, vector<64x32xf32>, vector<16x32xf32> -> vector<16x32xf32>
    %118 = vector.broadcast %16 : vector<1x32xf32> to vector<16x32xf32>
    %119 = arith.addf %117, %118 : vector<16x32xf32>
    %120 = arith.addf %97, %119 : vector<16x32xf32>
    %cst_43 = arith.constant dense<0.000000e+00> : vector<16xf32>
    %121 = vector.multi_reduction <add>, %120, %cst_43 [1] : vector<16x32xf32> to vector<16xf32>
    %122 = vector.shape_cast %121 : vector<16xf32> to vector<16x1xf32>
    %cst_44 = arith.constant 3.200000e+01 : f32
    %123 = vector.broadcast %cst_44 : f32 to vector<16x1xf32>
    %124 = arith.divf %122, %123 : vector<16x1xf32>
    %125 = vector.broadcast %124 : vector<16x1xf32> to vector<16x32xf32>
    %126 = arith.subf %120, %125 : vector<16x32xf32>
    %127 = vector.broadcast %124 : vector<16x1xf32> to vector<16x32xf32>
    %128 = arith.subf %120, %127 : vector<16x32xf32>
    %129 = arith.mulf %126, %128 : vector<16x32xf32>
    %cst_45 = arith.constant dense<0.000000e+00> : vector<16xf32>
    %130 = vector.multi_reduction <add>, %129, %cst_45 [1] : vector<16x32xf32> to vector<16xf32>
    %131 = vector.shape_cast %130 : vector<16xf32> to vector<16x1xf32>
    %cst_46 = arith.constant 3.200000e+01 : f32
    %132 = vector.broadcast %cst_46 : f32 to vector<16x1xf32>
    %133 = arith.divf %131, %132 : vector<16x1xf32>
    %134 = vector.broadcast %124 : vector<16x1xf32> to vector<16x32xf32>
    %135 = arith.subf %120, %134 : vector<16x32xf32>
    %cst_47 = arith.constant 9.99999996E-13 : f32
    %136 = vector.broadcast %cst_47 : f32 to vector<16x1xf32>
    %137 = arith.addf %133, %136 : vector<16x1xf32>
    %138 = math.rsqrt %137 : vector<16x1xf32>
    %139 = vector.broadcast %138 : vector<16x1xf32> to vector<16x32xf32>
    %140 = arith.mulf %135, %139 : vector<16x32xf32>
    %141 = vector.broadcast %17 : vector<1x32xf32> to vector<16x32xf32>
    %142 = arith.mulf %140, %141 : vector<16x32xf32>
    %143 = vector.broadcast %18 : vector<1x32xf32> to vector<16x32xf32>
    %144 = arith.addf %142, %143 : vector<16x32xf32>
    %145 = vector.shape_cast %144 : vector<16x32xf32> to vector<2x8x32xf32>
    %146 = vector.extract_strided_slice %145 {offsets = [0, 0, 0], sizes = [2, 1, 32], strides = [1, 1, 1]} : vector<2x8x32xf32> to vector<2x1x32xf32>
    %147 = vector.shape_cast %146 : vector<2x1x32xf32> to vector<2x32xf32>
    %c0_48 = arith.constant 0 : index
    %c0_49 = arith.constant 0 : index
    %148 = vector.load %arg6[%c0_48, %c0_49] : memref<32x32xf32, #tpu.memory_space<vmem>>, vector<32x32xf32>
    %cst_50 = arith.constant dense<0.000000e+00> : vector<2x32xf32>
    %149 = tpu.matmul %147, %148, %cst_50 {dimension_numbers = #tpu.dot_dimension_numbers<[1], [0], [0], [1], [0, 0, 1, 1], [], []>} : vector<2x32xf32>, vector<32x32xf32>, vector<2x32xf32> -> vector<2x32xf32>
    %150 = vector.broadcast %19 : vector<1x32xf32> to vector<2x32xf32>
    %151 = arith.addf %149, %150 : vector<2x32xf32>
    %152 = math.tanh %151 : vector<2x32xf32>
    %c0_51 = arith.constant 0 : index
    %c0_52 = arith.constant 0 : index
    %153 = vector.load %arg7[%c0_51, %c0_52] : memref<32x128xf32, #tpu.memory_space<vmem>>, vector<32x128xf32>
    %cst_53 = arith.constant dense<0.000000e+00> : vector<2x128xf32>
    %154 = tpu.matmul %152, %153, %cst_53 {dimension_numbers = #tpu.dot_dimension_numbers<[1], [0], [0], [1], [0, 0, 1, 1], [], []>} : vector<2x32xf32>, vector<32x128xf32>, vector<2x128xf32> -> vector<2x128xf32>
    %c0_54 = arith.constant 0 : index
    %c0_55 = arith.constant 0 : index
    %155 = vector.load %arg10[%c0_54, %c0_55] : memref<1x128xf32, #tpu.memory_space<vmem>>, vector<1x128xf32>
    %156 = vector.broadcast %155 : vector<1x128xf32> to vector<2x128xf32>
    %157 = arith.addf %154, %156 : vector<2x128xf32>
    %c0_56 = arith.constant 0 : index
    %c0_57 = arith.constant 0 : index
    %158 = vector.load %arg12[%c0_56, %c0_57] : memref<2x128xf32, #tpu.memory_space<vmem>>, vector<2x128xf32>
    tpu.vector_store %arg12[%c0_56, %c0_57], %157 {strides = array<i32>} : memref<2x128xf32, #tpu.memory_space<vmem>>, vector<2x128xf32>,
    return
  }
}

</mosaic_0001>

<bundles_post_ra>
// kernel: bert_classifier_forward.1
= control target key start
LH: loop header
LB: loop body
LE: loop exit
PB: predicated region body
PF: predicated region fallthrough
CT: control target
= control target key end

     0   :  { %s1092_s0 = inlined_call_operand.vmem [shape: s32[2,1,1], index: 0, kind: input, shape index: {}]   ;;  %s1093_s1 = inlined_call_operand.vmem [shape: f32[16,32], index: 1, kind: input, shape index: {}]   ;;  %s1094_s2 = inlined_call_operand.vmem [shape: f32[32,96], index: 2, kind: input, shape index: {}]   ;;  %s1095_s3 = inlined_call_operand.vmem [shape: f32[32,32], index: 3, kind: input, shape index: {}]   ;;  %s1096_s4 = inlined_call_operand.vmem [shape: f32[32,64], index: 4, kind: input, shape index: {}]   ;;  %s1097_s5 = inlined_call_operand.vmem [shape: f32[64,32], index: 5, kind: input, shape index: {}]   ;;  %s1098_s6 = inlined_call_operand.vmem [shape: f32[32,32], index: 6, kind: input, shape index: {}]   ;;  %s1099_s7 = inlined_call_operand.vmem [shape: f32[32,128], index: 7, kind: input, shape index: {}]   ;;  %s1100_s8 = inlined_call_operand.vmem [shape: f32[1,96], index: 8, kind: input, shape index: {}]   ;;  %s1101_s9 = inlined_call_operand.vmem [shape: f32[1,64], index: 9, kind: input, shape index: {}]   ;;  %s1102_s10 = inlined_call_operand.vmem [shape: f32[1,128], index: 10, kind: input, shape index: {}]   ;;  %s1103_s11 = inlined_call_operand.vmem [shape: f32[8,32], index: 11, kind: input, shape index: {}]   ;;  %s1104_s12 = inlined_call_operand.hbm [shape: f32[2,128], index: 12, kind: output, shape index: {}]  }
   0x1   :  { %v70_v0 = vld [vmem:[%s1094_s2 + $0x18] sm:$0xff]  ;;  %v69_v1 = vld [vmem:[%s1094_s2 + $0x10] sm:$0xff]  ;;  %v68_v2 = vld [vmem:[%s1094_s2 + $0x8] sm:$0xff] }
   0x2   :  { %94 = vmatpush.msra.mxu0 %v70_v0 }
   0x4   :  { %95 = vmatpush.msra.mxu0 %v69_v1 }
   0x5   :  { %17 = vsyncpa [#allocation3], 0  ;;  %v67_v3 = vld [vmem:[%s1094_s2] sm:$0xff]  ;;  %vm75_vm0 = vcmask 261120   ;;  %v916_v5 = vld [vmem:[%s1093_s1 + $0x8] sm:$0xff]  ;;  %s820_s16 = smov 96   ;;  %v42_v18 = vlaneseq }
   0x6   :  { %96 = vmatpush.msra.mxu0 %v68_v2  ;;  %v909_v4 = vld [vmem:[%s1093_s1] sm:$0xff]  ;;  %v821_v11 = vmov 0   ;;  %vm114_vm1 = vcmask 130048   ;;  %v822_v22 = vmov 0.0   ;;  %vm168_vm3 = vcmask 64512   ;;  %s824_s19 = smov 80  }
   0x7   :  { %v759_v6 = vld [vmem:[%s1100_s8] ss:$0 sm:$0xff]  ;;  %757 = vset.pattern.permute.xlu1 %v821_v11  ;;  %758 = vset.pattern.permute.xlu0 %v821_v11  ;;  %v45_v13 = vld [vmem:[%s1092_s0 + $0x1] sm:$0x1]  ;;  %v43_v20 = vand.u32 127, %v42_v18  ;;  %s825_s20 = smov 112  }
   0x8   :  { %97 = vmatpush.msra.mxu0 %v67_v3  ;;  %v44_v12 = vld [vmem:[%s1092_s0] sm:$0x1]  ;;  %s823_s0 = smov 64   ;;  %v106_v51 = vld [vmem:[%s1095_s3 + $0x8] sm:$0xff]  ;;  %s826_s25 = smov 48   ;;  %vm557_vm12 = vcmask 523264  }
   0x9   :  { %724 = vmatmul.msk.f32.vlgmr.msra.gmra.mxu0 %vm75_vm0, %v909_v4  ;;  %47 = vperm.xlu1 %757, %v44_v12   ;;  %v105_v60 = vld [vmem:[%s1095_s3] sm:$0xff]  ;;  %s828_s23 = smov [#allocation2]  }
   0xa   :  { %422 = vmatpush.msrb.mxu0 %v106_v51  ;;  %s709_s24 = sshll.u32 %s828_s23, 4  ;;  %s710_s24 = int_to_ptr.vmem [resolvable:$true] %s709_s24 }
   0xc   :  { %423 = vmatpush.msrb.mxu0 %v105_v60  ;;  %v494_v60 = vld [vmem:[%s1096_s4 + $0x8] sm:$0xff] }
  0x11   :  { %725 = vmatmul.msk.f32.gmra.mxu0 %vm75_vm0, %v916_v5  ;;  %51 = vperm.xlu1 %757, %v45_v13  }
  0x7b   :  { %v48_v19 = vpop.permute.xlu1 %47 }
  0x7c   :  { %v49_v21 = vperm.slane %v48_v19, 0 }
  0x7e   :  { %vm54_vm2 = vcmp.lt.s32.totalorder %v43_v20, %v49_v21 }
  0x7f   :  { %v720_v23 = vsel %vm54_vm2, 1.0, %v822_v22 }
  0x80   :  { %v722_v24 = vadd.f32 -1.0, %v720_v23 }
  0x82   :  { %v941_v26 = vmul.f32 1e+09, %v722_v24 }
  0x83   :  { %v52_v25 = vpop.permute.xlu1 %51 }
  0x84   :  { %v53_v27 = vperm.slane %v52_v25, 0 }
  0x86   :  { %v99_v7 = vpop.f32.mrf.mxu0  ;;  %vm55_vm4 = vcmp.lt.s32.totalorder %v43_v20, %v53_v27 }
  0x87   :  { %v923_v8 = vadd.f32 %v759_v6, %v99_v7  ;;  %v721_v31 = vsel %vm55_vm4, 1.0, %v822_v22  ;;  %vm647_vm4 = vcmask 1041409  }
  0x88   :  { %v723_v32 = vadd.f32 -1.0, %v721_v31 }
  0x89   :  { %112 = vrot.lane.b32.xlu0 %v923_v8, %s820_s16  ;;  %v109_v15 = vmul.f32 0.25, %v923_v8 }
  0x8a   :  { %v945_v33 = vmul.f32 1e+09, %v723_v32 }
  0x8e   :  { %v102_v9 = vpop.f32.mrf.mxu0 }
  0x8f   :  { %v926_v10 = vadd.f32 %v759_v6, %v102_v9 }
  0x91   :  { %141 = vrot.lane.b32.xlu0 %v926_v10, %s820_s16  ;;  %v110_v17 = vmul.f32 0.25, %v926_v10 }
  0xfb   :  { %v113_v14 = vpop.permute.xlu0 %112 }
  0xfc   :  { %726 = vmatpush.xpose.msk.msra.mxu1 %vm114_vm1, %v113_v14 }
  0xff   :  { %727 = vmatmul.msk.f32.vlgmr.msra.gmra.mxu1 %vm114_vm1, %v109_v15 }
 0x103   :  { %v142_v16 = vpop.permute.xlu0 %141 }
 0x104   :  { %728 = vmatpush.xpose.msk.msra.mxu2 %vm114_vm1, %v142_v16 }
 0x107   :  { %729 = vmatmul.msk.f32.vlgmr.msra.gmra.mxu2 %vm114_vm1, %v110_v17 }
 0x17c   :  { %v137_v28 = vpop.f32.mrf.mxu1 }
 0x17d   :  { %v138_v29 = vadd.f32 %v137_v28, %v941_v26 }
 0x17f   :  { %v169_v30 = vsel %vm168_vm3, %v138_v29, -inf }
 0x180   :  { %170 = vmax.xlane.f32.xlu2 %v169_v30 }
 0x18a   :  { %v165_v34 = vpop.f32.mrf.mxu2 }
 0x18b   :  { %v166_v35 = vadd.f32 %v165_v34, %v945_v33 }
 0x18d   :  { %v172_v36 = vsel %vm168_vm3, %v166_v35, -inf }
 0x18e   :  { %173 = vmax.xlane.f32.xlu2 %v172_v36 }
 0x1a6   :  { %191 = vrot.lane.b32.xlu2 %v923_v8, %s823_s0 }
 0x1ae   :  { %217 = vrot.lane.b32.xlu2 %v926_v10, %s823_s0 }
 0x1b6   :  { %245 = vrot.lane.b32.xlu2 %v923_v8, %s824_s19 }
 0x1be   :  { %243 = vrot.lane.b32.xlu2 %v109_v15, %s825_s20 }
 0x1f3   :  { %v171_v37 = vpop.xlane.xlu2 %170 }
 0x1f4   :  { %v175_v38 = vsub.f32 %v138_v29, %v171_v37  ;;  %v990_v29 = vld [vmem:[%s1103_s11] sm:$0xff] }
 0x1f5   :  { %v431_v30 = vperm.slane %v990_v29, 0 }
 0x1f6   :  { %v177_v39 = vmul.f32 1.442695, %v175_v38 }
 0x1f8   :  { %762 = vpow2.f32 %v177_v39 }
 0x1fe   :  { %v763_v40 = vpop.eup %762 }
 0x1ff   :  { %v181_v41 = vsel %vm168_vm3, %v763_v40, 0.0 }
 0x200   :  { %182 = vadd.xlane.f32.xlu0 %v181_v41 }
 0x201   :  { %v174_v42 = vpop.xlane.xlu2 %173 }
 0x202   :  { %v176_v43 = vsub.f32 %v166_v35, %v174_v42 }
 0x204   :  { %v179_v44 = vmul.f32 1.442695, %v176_v43  ;;  %v827_v43 = vmov 32.0  }
 0x206   :  { %764 = vpow2.f32 %v179_v44 }
 0x209   :  { %v192_v45 = vpop.permute.xlu2 %191 }
 0x20a   :  { %212 = vmatpush.msra.mxu3 %v192_v45 }
 0x20c   :  { %v765_v46 = vpop.eup %764 }
 0x20d   :  { %v184_v47 = vsel %vm168_vm3, %v765_v46, 0.0 }
 0x20e   :  { %185 = vadd.xlane.f32.xlu1 %v184_v47 }
 0x211   :  { %v218_v48 = vpop.permute.xlu2 %217 }
 0x212   :  { %238 = vmatpush.msrb.mxu3 %v218_v48 }
 0x214   :  { %273 = vrot.lane.b32.xlu0 %v926_v10, %s824_s19 }
 0x219   :  { %v246_v53 = vpop.permute.xlu2 %245 }
 0x221   :  { %v244_v58 = vpop.permute.xlu2 %243 }
 0x227   :  { %271 = vrot.lane.b32.xlu1 %v110_v17, %s825_s20 }
 0x273   :  { %v183_v49 = vpop.xlane.xlu0 %182 }
 0x274   :  { %766 = vrcp.f32 %v183_v49 }
 0x27a   :  { %v767_v50 = vpop.eup %766 }
 0x27b   :  { %v189_v52 = vmul.f32 %v767_v50, %v763_v40 }
 0x27d   :  { %730 = vmatmul.msk.f32.vlgmr.msra.gmra.mxu3 %vm168_vm3, %v189_v52 }
 0x27e   :  { %732 = vmatpush.xpose.msk.msra.mxu3 %vm114_vm1, %v246_v53 }
 0x281   :  { %v186_v54 = vpop.xlane.xlu1 %185 }
 0x282   :  { %768 = vrcp.f32 %v186_v54 }
 0x286   :  { %v274_v55 = vpop.permute.xlu0 %273 }
 0x287   :  { %734 = vmatpush.xpose.msk.msrb.mxu2 %vm114_vm1, %v274_v55 }
 0x288   :  { %v769_v56 = vpop.eup %768 }
 0x289   :  { %v190_v57 = vmul.f32 %v769_v56, %v765_v46 }
 0x28b   :  { %731 = vmatmul.msk.f32.vlgmr.msrb.gmra.mxu3 %vm168_vm3, %v190_v57 }
 0x293   :  { %733 = vmatmul.msk.f32.vlgmr.msra.gmra.mxu3 %vm114_vm1, %v244_v58  ;;  %v496_v58 = vld [vmem:[%s1096_s4 + $0x18] sm:$0xff] }
 0x299   :  { %v272_v59 = vpop.permute.xlu1 %271 }
 0x29a   :  { %735 = vmatmul.msk.f32.vlgmr.msrb.gmra.mxu2 %vm114_vm1, %v272_v59  ;;  %v495_v59 = vld [vmem:[%s1096_s4 + $0x10] sm:$0xff] }
 0x300   :  { %v214_v61 = vpop.f32.mrf.mxu3 }
 0x301   :  { %740 = vmatmul.msk.f32.vlgmr.msrb.gmra.mxu0 %vm114_vm1, %v214_v61  ;;  %v493_v61 = vld [vmem:[%s1096_s4] sm:$0xff] }
 0x30e   :  { %v240_v62 = vpop.f32.mrf.mxu3 }
 0x30f   :  { %741 = vmatmul.msk.f32.gmra.mxu0 %vm114_vm1, %v240_v62 }
 0x316   :  { %v268_v63 = vpop.f32.mrf.mxu3 }
 0x317   :  { %v269_v0 = vadd.f32 %v268_v63, %v941_v26 }
 0x319   :  { %v299_v1 = vsel %vm168_vm3, %v269_v0, -inf }
 0x31a   :  { %300 = vmax.xlane.f32.xlu2 %v299_v1 }
 0x31d   :  { %v296_v2 = vpop.f32.mrf.mxu2 }
 0x31e   :  { %v297_v3 = vadd.f32 %v296_v2, %v945_v33 }
 0x320   :  { %v302_v6 = vsel %vm168_vm3, %v297_v3, -inf }
 0x321   :  { %303 = vmax.xlane.f32.xlu0 %v302_v6 }
 0x332   :  { %321 = vrot.lane.b32.xlu2 %v923_v8, %s826_s25  ;;  %v108_v8 = vld [vmem:[%s1095_s3 + $0x18] sm:$0xff] }
 0x333   :  { %393 = vmatpush.msra.mxu2 %v108_v8 }
 0x37e   :  { %v425_v31 = vpop.f32.mrf.mxu0 }
 0x38c   :  { %v428_v37 = vpop.f32.mrf.mxu0 }
 0x38d   :  { %v301_v7 = vpop.xlane.xlu2 %300 }
 0x38e   :  { %v305_v9 = vsub.f32 %v269_v0, %v301_v7 }
 0x390   :  { %v307_v11 = vmul.f32 1.442695, %v305_v9 }
 0x392   :  { %770 = vpow2.f32 %v307_v11 }
 0x394   :  { %v304_v12 = vpop.xlane.xlu0 %303 }
 0x395   :  { %v306_v13 = vsub.f32 %v297_v3, %v304_v12  ;;  %v322_v14 = vpop.permute.xlu2 %321 }
 0x396   :  { %342 = vmatpush.msrb.mxu3 %v322_v14 }
 0x397   :  { %v309_v15 = vmul.f32 1.442695, %v306_v13 }
 0x398   :  { %v771_v16 = vpop.eup %770  ;;  %519 = vmatpush.msra.mxu3 %v496_v58 }
 0x399   :  { %772 = vpow2.f32 %v309_v15  ;;  %v311_v17 = vsel %vm168_vm3, %v771_v16, 0.0  ;;  %v487_v15 = vperm.slane %v990_v29, 1 }
 0x39a   :  { %312 = vadd.xlane.f32.xlu1 %v311_v17  ;;  %520 = vmatpush.msra.mxu3 %v495_v59  ;;  %v556_v59 = vperm.slane %v990_v29, 3 }
 0x39c   :  { %521 = vmatpush.msra.mxu3 %v494_v60 }
 0x39e   :  { %522 = vmatpush.msra.mxu3 %v493_v61 }
 0x39f   :  { %v773_v18 = vpop.eup %772 }
 0x3a0   :  { %v314_v19 = vsel %vm168_vm3, %v773_v18, 0.0 }
 0x3a1   :  { %315 = vadd.xlane.f32.xlu0 %v314_v19  ;;  %v490_v19 = vperm.slane %v990_v29, 2 }
 0x3b3   :  { %347 = vrot.lane.b32.xlu1 %v926_v10, %s826_s25  ;;  %v107_v10 = vld [vmem:[%s1095_s3 + $0x10] sm:$0xff] }
 0x3b4   :  { %394 = vmatpush.msra.mxu2 %v107_v10 }
 0x40d   :  { %v313_v20 = vpop.xlane.xlu1 %312 }
 0x40e   :  { %774 = vrcp.f32 %v313_v20 }
 0x414   :  { %v775_v21 = vpop.eup %774  ;;  %v316_v23 = vpop.xlane.xlu0 %315 }
 0x415   :  { %v319_v22 = vmul.f32 %v775_v21, %v771_v16  ;;  %776 = vrcp.f32 %v316_v23 }
 0x416   :  { %778 = vrcp.f32 %v827_v43 }
 0x417   :  { %736 = vmatmul.msk.f32.vlgmr.msrb.gmra.mxu3 %vm168_vm3, %v319_v22 }
 0x41b   :  { %v777_v24 = vpop.eup %776 }
 0x41c   :  { %v320_v26 = vmul.f32 %v777_v24, %v773_v18  ;;  %v779_v44 = vpop.eup %778 }
 0x41d   :  { %v443_v45 = vmul.f32 32.0, %v779_v44  ;;  %vm447_vm5 = vweird.f32 %v779_v44 }
 0x41f   :  { %v444_v46 = vsub.f32 1.0, %v443_v45 }
 0x421   :  { %v445_v47 = vmul.f32 %v779_v44, %v444_v46 }
 0x423   :  { %v446_v48 = vadd.f32 %v779_v44, %v445_v47 }
 0x425   :  { %v348_v25 = vpop.permute.xlu1 %347 }
 0x426   :  { %368 = vmatpush.msrb.mxu1 %v348_v25 }
 0x427   :  { %737 = vmatmul.msk.f32.vlgmr.msrb.gmra.mxu1 %vm168_vm3, %v320_v26 }
 0x49a   :  { %v344_v27 = vpop.f32.mrf.mxu3 }
 0x49b   :  { %738 = vmatmul.msk.f32.vlgmr.msra.gmra.mxu2 %vm114_vm1, %v344_v27 }
 0x4a4   :  { %v370_v28 = vpop.f32.mrf.mxu1 }
 0x4a5   :  { %739 = vmatmul.msk.f32.gmra.mxu2 %vm114_vm1, %v370_v28  ;;  %v555_v28 = vld [vmem:[%s1097_s5 + $0x38] sm:$0xff] }
 0x4a6   :  { %572 = vmatpush.msra.mxu1 %v555_v28 }
 0x51e   :  { %v396_v32 = vpop.f32.mrf.mxu2 }
 0x51f   :  { %v426_v33 = vadd.f32 %v425_v31, %v396_v32  ;;  %v553_v31 = vld [vmem:[%s1097_s5 + $0x28] sm:$0xff]  ;;  %v552_v32 = vld [vmem:[%s1097_s5 + $0x20] sm:$0xff] }
 0x521   :  { %v432_v34 = vadd.f32 %v431_v30, %v426_v33  ;;  %v551_v33 = vld [vmem:[%s1097_s5 + $0x18] sm:$0xff] }
 0x523   :  { %v434_v35 = vadd.f32 %v432_v34, %v909_v4  ;;  %v997_v4 = vsel %vm447_vm5, %v779_v44, %v446_v48  ;;  %v550_v34 = vld [vmem:[%s1097_s5 + $0x10] sm:$0xff] }
 0x525   :  { %v436_v36 = vsel %vm75_vm0, %v434_v35, 0.0 }
 0x526   :  { %437 = vadd.xlane.f32.xlu0 %v436_v36  ;;  %v548_v36 = vld [vmem:[%s1097_s5] sm:$0xff] }
 0x528   :  { %v399_v38 = vpop.f32.mrf.mxu2 }
 0x529   :  { %v429_v39 = vadd.f32 %v428_v37, %v399_v38  ;;  %v760_v37 = vld [vmem:[%s1101_s9] ss:$0 sm:$0xff] }
 0x52b   :  { %v433_v40 = vadd.f32 %v431_v30, %v429_v39  ;;  %v554_v30 = vld [vmem:[%s1097_s5 + $0x30] sm:$0xff] }
 0x52c   :  { %573 = vmatpush.msra.mxu1 %v554_v30 }
 0x52d   :  { %v435_v41 = vadd.f32 %v433_v40, %v916_v5 }
 0x52e   :  { %574 = vmatpush.msra.mxu1 %v553_v31 }
 0x52f   :  { %v439_v42 = vsel %vm75_vm0, %v435_v41, 0.0 }
 0x530   :  { %440 = vadd.xlane.f32.xlu2 %v439_v42  ;;  %575 = vmatpush.msra.mxu1 %v552_v32 }
 0x532   :  { %576 = vmatpush.msra.mxu1 %v551_v33 }
 0x534   :  { %577 = vmatpush.msra.mxu1 %v550_v34 }
 0x599   :  { %v438_v49 = vpop.xlane.xlu0 %437 }
 0x59a   :  { %v449_v50 = vmul.f32 %v997_v4, %v438_v49 }
 0x59c   :  { %v451_v51 = vsub.f32 %v434_v35, %v449_v50  ;;  %v549_v35 = vld [vmem:[%s1097_s5 + $0x8] sm:$0xff] }
 0x59d   :  { %578 = vmatpush.msra.mxu1 %v549_v35 }
 0x59e   :  { %v453_v52 = vmul.f32 %v451_v51, %v451_v51 }
 0x59f   :  { %579 = vmatpush.msra.mxu1 %v548_v36 }
 0x5a0   :  { %v455_v5 = vsel %vm75_vm0, %v453_v52, 0.0 }
 0x5a1   :  { %456 = vadd.xlane.f32.xlu0 %v455_v5 }
 0x5a3   :  { %v441_v53 = vpop.xlane.xlu2 %440 }
 0x5a4   :  { %v450_v54 = vmul.f32 %v997_v4, %v441_v53 }
 0x5a6   :  { %v452_v55 = vsub.f32 %v435_v41, %v450_v54 }
 0x5a8   :  { %v454_v56 = vmul.f32 %v452_v55, %v452_v55 }
 0x5aa   :  { %v458_v57 = vsel %vm75_vm0, %v454_v56, 0.0 }
 0x5ab   :  { %459 = vadd.xlane.f32.xlu0 %v458_v57 }
 0x614   :  { %v457_v62 = vpop.xlane.xlu0 %456 }
 0x615   :  { %v461_v63 = vmul.f32 %v457_v62, %v997_v4 }
 0x617   :  { %v463_v0 = vadd.f32 1e-12, %v461_v63 }
 0x619   :  { %780 = vrsqrt.f32 %v463_v0  ;;  %vm471_vm7 = vweird.f32 %v463_v0 }
 0x61e   :  { %v460_v1 = vpop.xlane.xlu0 %459 }
 0x61f   :  { %v781_v2 = vpop.eup %780  ;;  %v462_v3 = vmul.f32 %v460_v1, %v997_v4 }
 0x620   :  { %v466_v6 = vmul.f32 %v781_v2, %v463_v0  ;;  %vm472_vm6 = vweird.f32 %v781_v2 }
 0x621   :  { %v464_v7 = vadd.f32 1e-12, %v462_v3  ;;  %vm473_vm8 = vmor %vm471_vm7, %vm472_vm6 }
 0x622   :  { %v467_v9 = vmul.f32 %v781_v2, %v466_v6 }
 0x623   :  { %782 = vrsqrt.f32 %v464_v7  ;;  %vm481_vm10 = vweird.f32 %v464_v7 }
 0x624   :  { %v468_v11 = vmul.f32 0.5, %v467_v9 }
 0x626   :  { %v469_v12 = vsub.f32 1.5, %v468_v11 }
 0x628   :  { %v470_v13 = vmul.f32 %v781_v2, %v469_v12 }
 0x629   :  { %v783_v14 = vpop.eup %782 }
 0x62a   :  { %v474_v16 = vsel %vm473_vm8, %v781_v2, %v470_v13  ;;  %v476_v17 = vmul.f32 %v783_v14, %v464_v7  ;;  %vm482_vm9 = vweird.f32 %v783_v14 }
 0x62b   :  { %v485_v18 = vmul.f32 %v474_v16, %v451_v51  ;;  %vm483_vm11 = vmor %vm481_vm10, %vm482_vm9 }
 0x62c   :  { %v477_v8 = vmul.f32 %v783_v14, %v476_v17 }
 0x62d   :  { %v488_v20 = vmul.f32 %v487_v15, %v485_v18  ;;  %v642_v18 = vld [vmem:[%s1098_s6 + $0x18] sm:$0xff] }
 0x62e   :  { %v478_v21 = vmul.f32 0.5, %v477_v8  ;;  %663 = vmatpush.msrb.mxu2 %v642_v18 }
 0x62f   :  { %v491_v22 = vadd.f32 %v490_v19, %v488_v20  ;;  %v641_v20 = vld [vmem:[%s1098_s6 + $0x10] sm:$0xff] }
 0x630   :  { %v479_v23 = vsub.f32 1.5, %v478_v21  ;;  %v640_v21 = vld [vmem:[%s1098_s6 + $0x8] sm:$0xff]  ;;  %664 = vmatpush.msrb.mxu2 %v641_v20 }
 0x631   :  { %742 = vmatmul.msk.f32.vlgmr.msra.gmra.mxu3 %vm75_vm0, %v491_v22 }
 0x632   :  { %v480_v24 = vmul.f32 %v783_v14, %v479_v23  ;;  %v639_v23 = vld [vmem:[%s1098_s6] sm:$0xff]  ;;  %665 = vmatpush.msrb.mxu2 %v640_v21 }
 0x634   :  { %v484_v25 = vsel %vm483_vm11, %v783_v14, %v480_v24  ;;  %666 = vmatpush.msrb.mxu2 %v639_v23 }
 0x635   :  { %v486_v26 = vmul.f32 %v484_v25, %v452_v55 }
 0x637   :  { %v489_v10 = vmul.f32 %v487_v15, %v486_v26 }
 0x639   :  { %v492_v27 = vadd.f32 %v490_v19, %v489_v10 }
 0x63b   :  { %743 = vmatmul.msk.f32.gmra.mxu3 %vm75_vm0, %v492_v27 }
 0x6b4   :  { %v524_v38 = vpop.f32.mrf.mxu3 }
 0x6b5   :  { %v525_v39 = vadd.f32 %v760_v37, %v524_v38 }
 0x6b7   :  { %v532_v40 = vmul.f32 0.044715, %v525_v39  ;;  %v530_v52 = vmul.f32 0.5, %v525_v39 }
 0x6b9   :  { %v534_v41 = vmul.f32 %v532_v40, %v525_v39 }
 0x6bb   :  { %v536_v42 = vmul.f32 %v534_v41, %v525_v39  ;;  %v636_v41 = vperm.slane %v990_v29, 5 }
 0x6bd   :  { %v538_v43 = vadd.f32 %v536_v42, %v525_v39 }
 0x6be   :  { %v527_v44 = vpop.f32.mrf.mxu3 }
 0x6bf   :  { %v540_v45 = vmul.f32 0.7978846, %v538_v43  ;;  %v528_v46 = vadd.f32 %v760_v37, %v527_v44  ;;  %v633_v37 = vperm.slane %v990_v29, 4 }
 0x6c1   :  { %784 = vtanh.f32 %v540_v45  ;;  %v533_v47 = vmul.f32 0.044715, %v528_v46  ;;  %v531_v56 = vmul.f32 0.5, %v528_v46 }
 0x6c3   :  { %v535_v48 = vmul.f32 %v533_v47, %v528_v46 }
 0x6c5   :  { %v537_v49 = vmul.f32 %v535_v48, %v528_v46 }
 0x6c7   :  { %v785_v50 = vpop.eup %784  ;;  %v539_v51 = vadd.f32 %v537_v49, %v528_v46 }
 0x6c8   :  { %v544_v5 = vadd.f32 1.0, %v785_v50  ;;  %v675_v50 = vld [vmem:[%s1099_s7 + $0x18] sm:$0xff] }
 0x6c9   :  { %v541_v53 = vmul.f32 0.7978846, %v539_v51  ;;  %v674_v51 = vld [vmem:[%s1099_s7 + $0x10] sm:$0xff]  ;;  %695 = vmatpush.msra.mxu0 %v675_v50 }
 0x6ca   :  { %v546_v54 = vmul.f32 %v544_v5, %v530_v52  ;;  %v673_v52 = vld [vmem:[%s1099_s7 + $0x8] sm:$0xff]  ;;  %v672_v5 = vld [vmem:[%s1099_s7] sm:$0xff]  ;;  %s711_s7 = sshll.u32 %s1104_s12, 4  ;;  %s712_s7 = int_to_ptr.hbm [resolvable:$true] %s711_s7 }
 0x6cb   :  { %786 = vtanh.f32 %v541_v53  ;;  %696 = vmatpush.msra.mxu0 %v674_v51  ;;  %v643_v53 = vperm.slane %v990_v29, 6 }
 0x6cc   :  { %744 = vmatmul.msk.f32.vlgmr.msra.gmra.mxu1 %vm557_vm12, %v546_v54 }
 0x6cd   :  { %697 = vmatpush.msra.mxu0 %v673_v52 }
 0x6cf   :  { %698 = vmatpush.msra.mxu0 %v672_v5 }
 0x6d1   :  { %v787_v55 = vpop.eup %786 }
 0x6d2   :  { %v545_v57 = vadd.f32 1.0, %v787_v55 }
 0x6d4   :  { %v547_v58 = vmul.f32 %v545_v57, %v531_v56  ;;  %v761_v57 = vld [vmem:[%s1102_s10] ss:$0 sm:$0xff] }
 0x6d6   :  { %745 = vmatmul.msk.f32.gmra.mxu1 %vm557_vm12, %v547_v58 }
 0x749   :  { %v581_v60 = vpop.f32.mrf.mxu1 }
 0x74a   :  { %v582_v61 = vadd.f32 %v581_v60, %v556_v59 }
 0x74c   :  { %v587_v62 = vadd.f32 %v582_v61, %v491_v22 }
 0x74e   :  { %v589_v63 = vsel %vm75_vm0, %v587_v62, 0.0 }
 0x74f   :  { %590 = vadd.xlane.f32.xlu0 %v589_v63 }
 0x753   :  { %v584_v0 = vpop.f32.mrf.mxu1 }
 0x754   :  { %v585_v1 = vadd.f32 %v584_v0, %v556_v59 }
 0x756   :  { %v588_v2 = vadd.f32 %v585_v1, %v492_v27 }
 0x758   :  { %v592_v3 = vsel %vm75_vm0, %v588_v2, 0.0 }
 0x759   :  { %593 = vadd.xlane.f32.xlu1 %v592_v3 }
 0x7c2   :  { %v591_v6 = vpop.xlane.xlu0 %590 }
 0x7c3   :  { %v595_v11 = vmul.f32 %v591_v6, %v997_v4 }
 0x7c5   :  { %v597_v14 = vsub.f32 %v587_v62, %v595_v11 }
 0x7c7   :  { %v599_v16 = vmul.f32 %v597_v14, %v597_v14 }
 0x7c9   :  { %v601_v17 = vsel %vm75_vm0, %v599_v16, 0.0 }
 0x7cc   :  { %v594_v7 = vpop.xlane.xlu1 %593 }
 0x7cd   :  { %v596_v9 = vmul.f32 %v594_v7, %v997_v4 }
 0x7cf   :  { %v598_v12 = vsub.f32 %v588_v2, %v596_v9 }
 0x7d1   :  { %v600_v13 = vmul.f32 %v598_v12, %v598_v12 }
 0x7d3   :  { %v604_v15 = vsel %vm75_vm0, %v600_v13, 0.0 }
 0x7d4   :  { %605 = vadd.xlane.f32.xlu0 %v604_v15 }
 0x7dc   :  { %602 = vadd.xlane.f32.xlu0 %v601_v17 }
 0x847   :  { %v606_v19 = vpop.xlane.xlu0 %605 }
 0x848   :  { %v608_v8 = vmul.f32 %v606_v19, %v997_v4 }
 0x84a   :  { %v610_v22 = vadd.f32 1e-12, %v608_v8 }
 0x84c   :  { %788 = vrsqrt.f32 %v610_v22  ;;  %vm627_vm14 = vweird.f32 %v610_v22 }
 0x84f   :  { %v603_v24 = vpop.xlane.xlu0 %602 }
 0x850   :  { %v607_v25 = vmul.f32 %v603_v24, %v997_v4 }
 0x852   :  { %v789_v26 = vpop.eup %788  ;;  %v609_v10 = vadd.f32 1e-12, %v607_v25 }
 0x853   :  { %v622_v27 = vmul.f32 %v789_v26, %v610_v22  ;;  %vm628_vm13 = vweird.f32 %v789_v26 }
 0x854   :  { %790 = vrsqrt.f32 %v609_v10  ;;  %vm629_vm15 = vmor %vm627_vm14, %vm628_vm13  ;;  %vm617_vm2 = vweird.f32 %v609_v10 }
 0x855   :  { %v623_v28 = vmul.f32 %v789_v26, %v622_v27 }
 0x857   :  { %v624_v30 = vmul.f32 0.5, %v623_v28 }
 0x859   :  { %v625_v31 = vsub.f32 1.5, %v624_v30 }
 0x85a   :  { %v791_v32 = vpop.eup %790 }
 0x85b   :  { %v626_v33 = vmul.f32 %v789_v26, %v625_v31  ;;  %v612_v34 = vmul.f32 %v791_v32, %v609_v10  ;;  %vm618_vm1 = vweird.f32 %v791_v32 }
 0x85c   :  { %vm619_vm3 = vmor %vm617_vm2, %vm618_vm1 }
 0x85d   :  { %v630_v35 = vsel %vm629_vm15, %v789_v26, %v626_v33  ;;  %v613_v36 = vmul.f32 %v791_v32, %v612_v34 }
 0x85e   :  { %v632_v38 = vmul.f32 %v630_v35, %v598_v12 }
 0x85f   :  { %v614_v39 = vmul.f32 0.5, %v613_v36 }
 0x860   :  { %v635_v40 = vmul.f32 %v633_v37, %v632_v38 }
 0x861   :  { %v615_v4 = vsub.f32 1.5, %v614_v39 }
 0x862   :  { %v638_v45 = vadd.f32 %v636_v41, %v635_v40 }
 0x863   :  { %v616_v42 = vmul.f32 %v791_v32, %v615_v4 }
 0x864   :  { %v646_v48 = vrot.slane %v638_v45, 7 }
 0x865   :  { %v620_v43 = vsel %vm619_vm3, %v791_v32, %v616_v42 }
 0x866   :  { %v631_v44 = vmul.f32 %v620_v43, %v597_v14 }
 0x868   :  { %v634_v46 = vmul.f32 %v633_v37, %v631_v44 }
 0x86a   :  { %v637_v47 = vadd.f32 %v636_v41, %v634_v46 }
 0x86c   :  { %v648_v49 = vsel %vm647_vm4, %v646_v48, %v637_v47 }
 0x86d   :  { %746 = vmatmul.msk.f32.vlgmr.msrb.gmra.mxu2 %vm75_vm0, %v648_v49 }
 0x8f0   :  { %v668_v54 = vpop.f32.mrf.mxu2 }
 0x8f1   :  { %v669_v55 = vadd.f32 %v668_v54, %v643_v53 }
 0x8f3   :  { %792 = vtanh.f32 %v669_v55 }
 0x8f9   :  { %v793_v56 = vpop.eup %792 }
 0x8fa   :  { %747 = vmatmul.msk.f32.vlgmr.msra.gmra.mxu0 %vm75_vm0, %v793_v56 }
 0x977   :  { %v700_v58 = vpop.f32.mrf.mxu0 }
 0x978   :  { %v701_v59 = vadd.f32 %v761_v57, %v700_v58 }
 0x97a   :  { %703 = vst [vmem:[#allocation2] sm:$0x3] %v701_v59 }
 0x97b   :  { %714 = dma.vmem_to_hbm [thread:$0]  %s710_s24, 32, %s712_s7, [#allocation3]  }
 0x97c   :  { %818 = dma.done.wait [#allocation3], 32  }
 0x97d   :  { %819 = vsyncadd [#allocation3], 4294967264 }
 0x97e   :  { %719 = vsyncpa [#allocation3], 1 }

</bundles_post_ra>
